<compile_context>
chip_gen: v6e
topology: v6e:2x2x1
jax: 0.10.0
libtpu: 0.0.40
codegen_flags: <defaults>
</compile_context>

<pallas_src>
import functools

import jax
import jax.numpy as jnp
from jax import lax
from jax.experimental import pallas as pl
from jax.experimental.pallas import tpu as pltpu


# ---------------------------------------------------------------------------
# Kernels
# ---------------------------------------------------------------------------
def _unshuffle_slice_kernel(x_ref, o_ref, *, k1, k2, wo):
    """Main path: pure data movement (no MXU).

    x_ref: (c_blk, ho_blk, k1*k2*wo)  -- H already split by the wrapper view, so factor
                                         i lives in the contiguous lane range
                                         [i*k2*wo, (i+1)*k2*wo).
    o_ref: (c_blk, k1, k2, ho_blk, wo)
    """
    v = x_ref[...]
    for j in range(k2):
        # Lane de-interleave on the VALUE (strided *ref* reads are not used).
        vj = v[:, :, j::k2] if k2 > 1 else v          # lanes now ordered (i, wo)
        for i in range(k1):
            o_ref[:, i, j, :, :] = vj[:, :, i * wo:(i + 1) * wo]


def _unshuffle_mxu_kernel(x_ref, o_ref, *, k1, k2, wo, c_blk, ho_blk):
    """Fallback path: lane regroup via per-j 0/1 selection matmul (the v2 lowering)."""
    w = k2 * wo
    x2d = x_ref[...].reshape(c_blk * ho_blk, k1 * w)
    if k2 == 1:
        for i in range(k1):
            o_ref[:, i, 0, :, :] = x2d[:, i * w:(i + 1) * w].reshape(c_blk, ho_blk, wo)
        return
    if x_ref.dtype == jnp.bfloat16:
        cdtype, prec = jnp.bfloat16, lax.Precision.DEFAULT    # x*1.0 + f32 acc: exact
    else:
        cdtype, prec = jnp.float32, lax.Precision.HIGHEST
        # TODO(synk): integer inputs take the f32 MXU fallback (exact only < 2**24);
        # the main slice path above is exact for all dtypes.
    row = lax.broadcasted_iota(jnp.int32, (w, wo), 0)
    col = lax.broadcasted_iota(jnp.int32, (w, wo), 1)
    for j in range(k2):
        # Column block j of the selection matrix: pw_j[l, q] = (l == q*k2 + j).
        pw_j = (row == col * k2 + j).astype(cdtype)
        for i in range(k1):
            slab = x2d[:, i * w:(i + 1) * w].astype(cdtype)
            y = jnp.dot(slab, pw_j, precision=prec,
                        preferred_element_type=jnp.float32)
            o_ref[:, i, j, :, :] = y.astype(o_ref.dtype).reshape(c_blk, ho_blk, wo)


# ---------------------------------------------------------------------------
# Wrapper / tiling
# ---------------------------------------------------------------------------
def _pick_vmem_limit():
    """Scoped-VMEM request: half of physical, clamped to [32, 64] MiB."""
    try:
        phys = int(getattr(pltpu.get_tpu_info(), "vmem_capacity_bytes", 0))
    except Exception:
        phys = 0
    if phys <= 0:
        return 32 * 1024 * 1024                       # safe default on v5e/v6e/v7x
    return max(32 * 1024 * 1024, min(64 * 1024 * 1024, phys // 2))


def _padded_tile_bytes(rows, cols, itemsize):
    return (-(-rows // 8) * 8) * (-(-cols // 128) * 128) * itemsize


@functools.lru_cache(maxsize=None)
def _build_unshuffle(n, ho, wo, k1, k2, c_blk, ho_blk, dtype_str, vmem_limit, use_mxu):
    dtype = jnp.dtype(dtype_str)
    itemsize = dtype.itemsize
    lw = k1 * k2 * wo
    grid = (n // c_blk, ho // ho_blk)
    if use_mxu:
        kernel = functools.partial(_unshuffle_mxu_kernel, k1=k1, k2=k2, wo=wo,
                                   c_blk=c_blk, ho_blk=ho_blk)
        flops = 2 * n * ho * k1 * k2 * (k2 * wo) * wo
    else:
        kernel = functools.partial(_unshuffle_slice_kernel, k1=k1, k2=k2, wo=wo)
        flops = 0                                     # pure data movement
    return pl.pallas_call(
        kernel,
        out_shape=jax.ShapeDtypeStruct((n, k1, k2, ho, wo), dtype),
        grid_spec=pltpu.PrefetchScalarGridSpec(
            num_scalar_prefetch=0,
            grid=grid,
            in_specs=[pl.BlockSpec((c_blk, ho_blk, lw), lambda g, t: (g, t, 0))],
            out_specs=pl.BlockSpec((c_blk, k1, k2, ho_blk, wo),
                                   lambda g, t: (g, 0, 0, t, 0)),
        ),
        compiler_params=pltpu.CompilerParams(
            dimension_semantics=("parallel", "parallel"),
            vmem_limit_bytes=vmem_limit,
        ),
        cost_estimate=pl.CostEstimate(
            flops=flops,
            transcendentals=0,
            bytes_accessed=2 * n * ho * lw * itemsize,
        ),
    )


_SLICE_PATH_OK = None    # None = unknown, True / False once probed on this backend


def pixel_unshuffle_2d(x, kernel_size):
    """Forward of PixelUnshuffle2d: (B, C, H, W) -> (B, C*k1*k2, H//k1, W//k2)."""
    global _SLICE_PATH_OK
    if isinstance(kernel_size, int):
        kernel_size = (kernel_size, kernel_size)
    k1, k2 = int(kernel_size[0]), int(kernel_size[1])
    b, c, h, w = x.shape
    assert h % k1 == 0 and w % k2 == 0, "spatial dims must be divisible by kernel_size"
    ho, wo = h // k1, w // k2
    n = b * c
    lw = k1 * w                                        # == k1 * k2 * wo
    itemsize = jnp.dtype(x.dtype).itemsize

    vmem_limit = _pick_vmem_limit()
    block_budget = vmem_limit // 4                     # (in + out) block, x2 double-buffer

    def tile_bytes(hb):                                # padded in+out bytes per channel
        return (_padded_tile_bytes(hb, lw, itemsize)
                + k1 * k2 * _padded_tile_bytes(hb, wo, itemsize))

    # Spatial (Ho) tiling for very large planes: largest multiple-of-8 divisor of Ho
    # whose per-channel tile fits the block budget (keeps the (8,128) rule, no edge blocks).
    ho_blk = ho
    if ho > 8 and tile_bytes(ho) > block_budget:
        divs = [d for d in range(8, ho, 8) if ho % d == 0]
        if divs:
            good = [d for d in divs if tile_bytes(d) <= block_budget]
            ho_blk = max(good) if good else min(divs)
    # TODO(synk): no Wo tiling -- a single output row wider than the budget still yields
    # an oversized block (fails loudly rather than silently mis-tiling).
    ho_steps = ho // ho_blk

    # Channel blocking: fill the VMEM budget but keep >= ~8 total grid steps so the
    # pipeline hides head/tail DMAs and both v7x TensorCores get work.
    c_vmem = max(1, block_budget // max(1, tile_bytes(ho_blk)))
    chan_steps_target = min(n, -(-8 // ho_steps))
    c_par = max(1, n // chan_steps_target)
    c_blk = max(1, min(n, c_vmem, c_par))
    while n % c_blk:                                   # exact tiling: no partial blocks
        c_blk -= 1

    xv = x.reshape(n, ho, lw)                          # pure view: H split as (ho, k1)

    def run(use_mxu):
        fn = _build_unshuffle(n, ho, wo, k1, k2, c_blk, ho_blk, str(x.dtype),
                              vmem_limit, use_mxu)
        return fn(xv)

    # Eager pallas_call compiles at call time, so a lowering failure of the strided
    # value slice is catchable here and we fall back to the known-good MXU kernel.
    if _SLICE_PATH_OK is False:
        out6 = run(use_mxu=True)
    else:
        try:
            out6 = run(use_mxu=False)
            _SLICE_PATH_OK = True
        except Exception:
            if _SLICE_PATH_OK:                         # worked before -> real error
                raise
            _SLICE_PATH_OK = False
            out6 = run(use_mxu=True)

    # Pure view: (N, k1, k2, Ho, Wo) -> (B, C*k1*k2, Ho, Wo); channel = (c*k1 + i)*k2 + j.
    return out6.reshape(b, c * k1 * k2, ho, wo)


if __name__ == "__main__":
    key = jax.random.PRNGKey(0)
    B, C, H, W = 2, 4, 16, 16
    k = 2  # PixelUnshuffle2d(kernel_size=2); module has no learnable parameters

    x = jax.random.normal(key, (B, C, H, W), dtype=jnp.float32)

    out = jax.block_until_ready(pixel_unshuffle_2d(x, k))

    # pure-JAX reference of rearrange('b c (w k1) (h k2) -> b (c k1 k2) w h')
    ref = x.reshape(B, C, H // k, k, W // k, k).transpose(0, 1, 3, 5, 2, 4)
    ref = ref.reshape(B, C * k * k, H // k, W // k)

    assert out.shape == ref.shape
    assert out.dtype == x.dtype
    assert jnp.allclose(out, ref, rtol=1e-6, atol=1e-6), float(
        jnp.max(jnp.abs(out - ref))
    )
    print("KERNEL_OK")
</pallas_src>

<mosaic_0001>
module attributes {stable_mosaic.version = 11 : i64} {
  func.func @_unshuffle_mxu_kernel(%arg0: i32, %arg1: i32, %arg2: memref<1x8x32xf32, #tpu.memory_space<vmem>>, %arg3: memref<1x2x2x8x8xf32, #tpu.memory_space<vmem>>) attributes {dimension_semantics = [#tpu.dimension_semantics<parallel>, #tpu.dimension_semantics<parallel>], iteration_bounds = array<i64: 8, 1>, scalar_prefetch = 0 : i64, scratch_operands = 0 : i64, tpu.core_type = #tpu.core_type<tc>, window_params = [{transform_indices = @transform_0, window_bounds = array<i64: 1, 8, 32>}, {transform_indices = @transform_1, window_bounds = array<i64: 1, 2, 2, 8, 8>}]} {
    %c0 = arith.constant 0 : index
    %c0_0 = arith.constant 0 : index
    %c0_1 = arith.constant 0 : index
    %0 = vector.load %arg2[%c0, %c0_0, %c0_1] : memref<1x8x32xf32, #tpu.memory_space<vmem>>, vector<1x8x32xf32>
    %1 = vector.shape_cast %0 : vector<1x8x32xf32> to vector<8x32xf32>
    %2 = tpu.iota {dimensions = array<i32: 0>} : vector<16x8xi32>
    %3 = tpu.iota {dimensions = array<i32: 1>} : vector<16x8xi32>
    %c2_i32 = arith.constant 2 : i32
    %4 = vector.broadcast %c2_i32 : i32 to vector<16x8xi32>
    %5 = arith.muli %3, %4 : vector<16x8xi32>
    %c0_i32 = arith.constant 0 : i32
    %6 = vector.broadcast %c0_i32 : i32 to vector<16x8xi32>
    %7 = arith.addi %5, %6 : vector<16x8xi32>
    %8 = arith.cmpi eq, %2, %7 : vector<16x8xi32>
    %9 = arith.extui %8 : vector<16x8xi1> to vector<16x8xi32>
    %10 = arith.sitofp %9 : vector<16x8xi32> to vector<16x8xf32>
    %11 = vector.extract_strided_slice %1 {offsets = [0, 0], sizes = [8, 16], strides = [1, 1]} : vector<8x32xf32> to vector<8x16xf32>
    %cst = arith.constant dense<0.000000e+00> : vector<8x8xf32>
    %12 = tpu.matmul %11, %10, %cst {dimension_numbers = #tpu.dot_dimension_numbers<[1], [0], [0], [1], [0, 0, 1, 1], [], []>, precision = #tpu.contract_precision<fp32>} : vector<8x16xf32>, vector<16x8xf32>, vector<8x8xf32> -> vector<8x8xf32>
    %13 = vector.shape_cast %12 : vector<8x8xf32> to vector<1x8x8xf32>
    %c0_2 = arith.constant 0 : index
    %c0_3 = arith.constant 0 : index
    %c0_4 = arith.constant 0 : index
    %c0_5 = arith.constant 0 : index
    %c0_6 = arith.constant 0 : index
    %14 = vector.load %arg3[%c0_2, %c0_3, %c0_4, %c0_5, %c0_6] : memref<1x2x2x8x8xf32, #tpu.memory_space<vmem>>, vector<1x1x1x8x8xf32>
    %15 = vector.shape_cast %14 : vector<1x1x1x8x8xf32> to vector<1x8x8xf32>
    %16 = vector.shape_cast %13 : vector<1x8x8xf32> to vector<1x1x1x8x8xf32>
    tpu.vector_store %arg3[%c0_2, %c0_3, %c0_4, %c0_5, %c0_6], %16 {strides = array<i32>} : memref<1x2x2x8x8xf32, #tpu.memory_space<vmem>>, vector<1x1x1x8x8xf32>,
    %17 = vector.extract_strided_slice %1 {offsets = [0, 16], sizes = [8, 16], strides = [1, 1]} : vector<8x32xf32> to vector<8x16xf32>
    %cst_7 = arith.constant dense<0.000000e+00> : vector<8x8xf32>
    %18 = tpu.matmul %17, %10, %cst_7 {dimension_numbers = #tpu.dot_dimension_numbers<[1], [0], [0], [1], [0, 0, 1, 1], [], []>, precision = #tpu.contract_precision<fp32>} : vector<8x16xf32>, vector<16x8xf32>, vector<8x8xf32> -> vector<8x8xf32>
    %19 = vector.shape_cast %18 : vector<8x8xf32> to vector<1x8x8xf32>
    %c0_8 = arith.constant 0 : index
    %c1 = arith.constant 1 : index
    %c0_9 = arith.constant 0 : index
    %c0_10 = arith.constant 0 : index
    %c0_11 = arith.constant 0 : index
    %20 = vector.load %arg3[%c0_8, %c1, %c0_9, %c0_10, %c0_11] : memref<1x2x2x8x8xf32, #tpu.memory_space<vmem>>, vector<1x1x1x8x8xf32>
    %21 = vector.shape_cast %20 : vector<1x1x1x8x8xf32> to vector<1x8x8xf32>
    %22 = vector.shape_cast %19 : vector<1x8x8xf32> to vector<1x1x1x8x8xf32>
    tpu.vector_store %arg3[%c0_8, %c1, %c0_9, %c0_10, %c0_11], %22 {strides = array<i32>} : memref<1x2x2x8x8xf32, #tpu.memory_space<vmem>>, vector<1x1x1x8x8xf32>,
    %c2_i32_12 = arith.constant 2 : i32
    %23 = vector.broadcast %c2_i32_12 : i32 to vector<16x8xi32>
    %24 = arith.muli %3, %23 : vector<16x8xi32>
    %c1_i32 = arith.constant 1 : i32
    %25 = vector.broadcast %c1_i32 : i32 to vector<16x8xi32>
    %26 = arith.addi %24, %25 : vector<16x8xi32>
    %27 = arith.cmpi eq, %2, %26 : vector<16x8xi32>
    %28 = arith.extui %27 : vector<16x8xi1> to vector<16x8xi32>
    %29 = arith.sitofp %28 : vector<16x8xi32> to vector<16x8xf32>
    %30 = vector.extract_strided_slice %1 {offsets = [0, 0], sizes = [8, 16], strides = [1, 1]} : vector<8x32xf32> to vector<8x16xf32>
    %cst_13 = arith.constant dense<0.000000e+00> : vector<8x8xf32>
    %31 = tpu.matmul %30, %29, %cst_13 {dimension_numbers = #tpu.dot_dimension_numbers<[1], [0], [0], [1], [0, 0, 1, 1], [], []>, precision = #tpu.contract_precision<fp32>} : vector<8x16xf32>, vector<16x8xf32>, vector<8x8xf32> -> vector<8x8xf32>
    %32 = vector.shape_cast %31 : vector<8x8xf32> to vector<1x8x8xf32>
    %c0_14 = arith.constant 0 : index
    %c0_15 = arith.constant 0 : index
    %c1_16 = arith.constant 1 : index
    %c0_17 = arith.constant 0 : index
    %c0_18 = arith.constant 0 : index
    %33 = vector.load %arg3[%c0_14, %c0_15, %c1_16, %c0_17, %c0_18] : memref<1x2x2x8x8xf32, #tpu.memory_space<vmem>>, vector<1x1x1x8x8xf32>
    %34 = vector.shape_cast %33 : vector<1x1x1x8x8xf32> to vector<1x8x8xf32>
    %35 = vector.shape_cast %32 : vector<1x8x8xf32> to vector<1x1x1x8x8xf32>
    tpu.vector_store %arg3[%c0_14, %c0_15, %c1_16, %c0_17, %c0_18], %35 {strides = array<i32>} : memref<1x2x2x8x8xf32, #tpu.memory_space<vmem>>, vector<1x1x1x8x8xf32>,
    %36 = vector.extract_strided_slice %1 {offsets = [0, 16], sizes = [8, 16], strides = [1, 1]} : vector<8x32xf32> to vector<8x16xf32>
    %cst_19 = arith.constant dense<0.000000e+00> : vector<8x8xf32>
    %37 = tpu.matmul %36, %29, %cst_19 {dimension_numbers = #tpu.dot_dimension_numbers<[1], [0], [0], [1], [0, 0, 1, 1], [], []>, precision = #tpu.contract_precision<fp32>} : vector<8x16xf32>, vector<16x8xf32>, vector<8x8xf32> -> vector<8x8xf32>
    %38 = vector.shape_cast %37 : vector<8x8xf32> to vector<1x8x8xf32>
    %c0_20 = arith.constant 0 : index
    %c1_21 = arith.constant 1 : index
    %c1_22 = arith.constant 1 : index
    %c0_23 = arith.constant 0 : index
    %c0_24 = arith.constant 0 : index
    %39 = vector.load %arg3[%c0_20, %c1_21, %c1_22, %c0_23, %c0_24] : memref<1x2x2x8x8xf32, #tpu.memory_space<vmem>>, vector<1x1x1x8x8xf32>
    %40 = vector.shape_cast %39 : vector<1x1x1x8x8xf32> to vector<1x8x8xf32>
    %41 = vector.shape_cast %38 : vector<1x8x8xf32> to vector<1x1x1x8x8xf32>
    tpu.vector_store %arg3[%c0_20, %c1_21, %c1_22, %c0_23, %c0_24], %41 {strides = array<i32>} : memref<1x2x2x8x8xf32, #tpu.memory_space<vmem>>, vector<1x1x1x8x8xf32>,
    return
  }
  func.func @transform_0(%arg0: i32, %arg1: i32) -> (i32, i32, i32) {
    %c0_i32 = arith.constant 0 : i32
    %c0_i32_0 = arith.constant 0 : i32
    return %arg0, %arg1, %c0_i32 : i32, i32, i32
  }
  func.func @transform_1(%arg0: i32, %arg1: i32) -> (i32, i32, i32, i32, i32) {
    %c0_i32 = arith.constant 0 : i32
    %c0_i32_0 = arith.constant 0 : i32
    %c0_i32_1 = arith.constant 0 : i32
    %c0_i32_2 = arith.constant 0 : i32
    return %arg0, %c0_i32, %c0_i32_0, %arg1, %c0_i32_1 : i32, i32, i32, i32, i32
  }
}

</mosaic_0001>

<bundles_post_ra>
// kernel: tpu_custom_call.1
= control target key start
LH: loop header
LB: loop body
LE: loop exit
PB: predicated region body
PF: predicated region fallthrough
CT: control target
= control target key end

     0   :  { %6 = vsyncpa [#allocation3], 0  ;;  %s3050_s0 = inlined_call_operand.hbm [shape: f32[8,8,32], index: 0, kind: input, shape index: {}]   ;;  %s3051_s1 = inlined_call_operand.hbm [shape: f32[8,2,2,8,8], index: 1, kind: output, shape index: {}]  }
   0x1   :  { %8 = vsyncpa [#allocation3 + $0x1], 0 }
   0x2   :  { %9 = vsyncpa [#allocation4], 0 }
   0x3   :  { %11 = vsyncpa [#allocation4 + $0x1], 0  ;;  %s2602_s6 = smov 0   ;;  %s2604_s7 = smov 0  }
   0x4   :  { %s2606_s8 = smov 0   ;;  %s2608_s9 = smov 0  }
   0x5   :  { %s2610_s10 = smov 0   ;;  %s2612_s11 = smov 0  }
   0x6 LB: > { %s2120_s12 = sadd.s32 4294967295, %s2582_s11   ;;  %s2121_s13 = sadd.s32 4294967294, %s2582_s11   ;;  %s2582_s11 = sphi %s2612_s11, %s17_s11   ;;  %s2578_s10 = sphi %s2610_s10, %s3070_s10   ;;  %s2574_s9 = sphi %s2608_s9, %s3069_s9   ;;  %s2570_s8 = sphi %s2606_s8, %s3068_s8   ;;  %s2566_s7 = sphi %s2604_s7, %s3067_s7   ;;  %s2562_s6 = sphi %s2602_s6, %s3066_s6  }
   0x7   : > { %s29_s14 = sadd.s32 1, %s2578_s10  ;;  %s38_s15 = sadd.s32 1, %s2570_s8 }
   0x8   : > { %p31_p0 = scmp.ge.s32.totalorder %s29_s14, 8  ;;  %p45_p1 = scmp.ne.s32.totalorder %s2570_s8, %s2566_s7 }
   0x9   : > { %p46_p2 = scmp.eq.s32.totalorder %s2582_s11, 0  ;;  %p51_p3 = scmp.ne.s32.totalorder %s2566_s7, %s2562_s6 }
   0xa   : > { %s3072_s14 = smov (%p31_p0, %s29_s14), 0  ;;  %p52_p5 = scmp.eq.s32.totalorder %s2120_s12, 0 }
   0xb   : > { %p2643_p4 = por %p46_p2, %p45_p1  ;;  %s33_s17 = ssub.s32 %s2578_s10, %s3072_s14 }
   0xc   : > { %p77_p6 = scmp.eq.s32.totalorder %s2120_s12, 7  ;;  %p36_p7 = scmp.eq.s32.totalorder %s33_s17, 0 }
   0xd   : > { %p2649_p8 = por %p52_p5, %p51_p3  ;;  %p83_p10 = scmp.eq.s32.totalorder %s2121_s13, 7 }
   0xe   : > { %p2653_p9 = por %p77_p6, %p45_p1  ;;  %p2418_p12 = scmp.lt.s32.totalorder %s2582_s11, 8 }
   0xf   : > { %s2658_s20 = scalar_select %p36_p7, %s2570_s8, %s38_s15  }
  0x10   : > { %p2660_p11 = por %p83_p10, %p51_p3  ;;  %s103_s22 = sand.u32 1, %s2570_s8  }
  0x11   : > { %s2124_s23 = sshll.u32 %s103_s22, 3  ;;  %s2125_s24 = sshll.u32 %s2578_s10, 7 }
  0x12   : > { %s3055_s21 = scalar_select %p2660_p11, 1, 0 }
  0x13   : > { %s113_s27 = scalar_lea.hbm %s3050_s0, %s2125_s24  ;;  %s107_s28 = scalar_lea.vmem [#allocation2], %s2124_s23 }
  0x14   : > { %s115_s29 = sshll.u32 %s107_s28, 4  ;;  %p2672_p13 = pnand %p2418_p12, %p2643_p4  ;;  %s116_s29 = int_to_ptr.vmem [resolvable:$true] %s115_s29 }
  0x15   : > { %p2126_p0 = scmp.ge.s32.totalorder %s2582_s11, 1  ;;  %p120_p1 = scmp.lt.s32.totalorder %s2582_s11, 9 }
  0x16   : > { %s104_s2 = scalar_lea.sflag [#allocation3], %s103_s22  ;;  %p2476_p2 = pneg %p2672_p13 }
  0x17   : > { %s2487_s3 = scalar_lea.vmem %s116_s29, 128  ;;  %s2584_s4 = smov [#allocation2]  }
  0x18   : > { %p2488_p3 = scmp.ne.s32.totalorder %s116_s29, %s2487_s3  ;;  %s2492_s5 = sshll.u32 %s2584_s4, 4  ;;  %s2493_s5 = int_to_ptr.vmem [resolvable:$false] %s2492_s5 }
  0x19   : > { %s2494_s12 = scalar_lea.vmem %s2493_s5, 256  ;;  %p2495_p7 = scmp.lt.s32.totalorder %s116_s29, %s2493_s5 }
  0x1a   : > { %p2490_p5 = pnand %p2488_p3, %p2476_p2  ;;  %p2496_p10 = scmp.lt.s32.totalorder %s2494_s12, %s2487_s3 }
  0x1c   : > { %p2491_p6 = pneg %p2490_p5  ;;  %p2497_p4 = por %p2496_p10, %p2495_p7 }
  0x1e   : > { %p2498_p12 = pnand %p2497_p4, %p2491_p6 }
  0x20   : > { %2501 = shalt.err (!%p2498_p12)
}
  0x21   : > { %2413 = dma.hbm_to_vmem [thread:$0]  (!%p2672_p13), %s113_s27, 128, %s116_s29, %s104_s2  }
  0x22   : > { %p121_p11 = pnand %p2126_p0, %p120_p1 }
  0x23   : > { %s2687_s13 = sand.u32 (!%p121_p11), 1, %s2566_s7  }
  0x24   : > { %124 = sbr.rel (%p121_p11) target bundleno = 426 (0x1aa), region = 24  ;;  %s2127_s15 = sshll.u32 (!%p121_p11), %s2687_s13, 3 }
  0x25   : > { %s127_s16 = scalar_lea.sflag (!%p121_p11), [#allocation3], %s2687_s13  ;;  %s130_s17 = scalar_lea.vmem (!%p121_p11), [#allocation2], %s2127_s15 }
  0x29   : > { %2553 = dma.done.wait (%p2649_p8), %s127_s16, 128  }
  0x2a   : > { %2555 = vsyncadd (%p2649_p8), %s127_s16, 4294967168  ;;  %v150_v0 = vlaneseq  ;;  %v2585_v1 = vmov 0.0   ;;  %vm2586_vm0 = vmmov 0   ;;  %vm162_vm1 = vcmask 130048   ;;  %v149_v9 = vld [vmem:[%s130_s17] sm:$0xff]  ;;  %s2588_s18 = smov 112  }
  0x2b   : > { %2245 = vmatprep.subr.mxu1 %v2585_v1  ;;  %2249 = vmatprep.mubr.msk.f32.mxu1 %vm2586_vm0, %v2585_v1  ;;  %v2587_v12 = vmov 1.0   ;;  %v164_v13 = vsel %vm162_vm1, %v149_v9, 0  ;;  %s2128_s22 = sshll.u32 %s2687_s13, 5  ;;  %vm625_vm6 = vcmask 64512   ;;  %s2165_s25 = sshll.u32 %s2574_s9, 9 }
  0x2c   : > { %v151_v2 = vshrl.u32 %v150_v0, 7  ;;  %v154_v3 = vand.u32 127, %v150_v0  ;;  %2238 = vmatprep.subr.mxu0 %v2585_v1  ;;  %2242 = vmatprep.mubr.msk.f32.mxu0 %vm2586_vm0, %v2585_v1  ;;  %v2728_v17 = vand.u32 4294901760, %v164_v13  ;;  %s2986_s23 = scalar_lea.vmem [#allocation5], %s2128_s22  ;;  %s3001_s28 = scalar_lea.hbm %s3051_s1, %s2165_s25 }
  0x2d   : > { %627 = vrot.lane.b32.xlu0 %v149_v9, %s2588_s18  ;;  %s2036_s24 = sshll.u32 %s2986_s23, 4  ;;  %s2022_s29 = scalar_lea.sflag [#allocation4], %s2687_s13  ;;  %s2996_s24 = int_to_ptr.vmem [resolvable:$true] %s2036_s24 }
  0x2e   : > { %v152_v4 = vadd.s32 8, %v151_v2  ;;  %v155_v5 = vmul.u32 2, %v154_v3  ;;  %v2745_v21 = vsub.f32 %v164_v13, %v2728_v17  ;;  %s2502_s30 = scalar_lea.vmem %s2996_s24, 512  ;;  %s2589_s9 = smov [#allocation5]  }
  0x2f   : > { %p2503_p8 = scmp.ne.s32.totalorder %s2996_s24, %s2502_s30  ;;  %s2506_s2 = sshll.u32 %s2589_s9, 4  ;;  %s2507_s2 = int_to_ptr.vmem [resolvable:$false] %s2506_s2 }
  0x30   : > { %vm2701_vm2 = vcmp.eq.s32.totalorder %v152_v4, %v155_v5  ;;  %v1092_v7 = vadd.s32 1, %v155_v5  ;;  %vm2705_vm3 = vcmp.eq.s32.totalorder %v151_v2, %v155_v5  ;;  %v2752_v24 = vand.u32 4294901760, %v2745_v21  ;;  %s2508_s3 = scalar_lea.vmem %s2507_s2, 1024  ;;  %p2509_p0 = scmp.lt.s32.totalorder %s2996_s24, %s2507_s2 }
  0x31   : > { %v2130_v10 = vsel %vm2701_vm2, 1.0, %v2585_v1  ;;  %v2129_v11 = vsel %vm2705_vm3, 1.0, %v2585_v1  ;;  %2239 = vmatpush3.msk.msra.mxu0 %vm2701_vm2, %v2587_v12  ;;  %p2504_p11 = pnand %p2503_p8, %p2653_p9  ;;  %p2510_p1 = scmp.lt.s32.totalorder %s2508_s3, %s2502_s30 }
  0x32   : > { %v2719_v14 = vsub.f32 %v2130_v10, %v2130_v10  ;;  %vm2721_vm4 = vcmp.eq.s32.totalorder %v152_v4, %v1092_v7  ;;  %v2725_v16 = vsub.f32 %v2129_v11, %v2129_v11  ;;  %2240 = vmatprep.subr.mxu0 %v2585_v1  ;;  %vm2733_vm5 = vcmp.eq.s32.totalorder %v151_v2, %v1092_v7 }
  0x33   : > { %2241 = vmatpush3.msk.msra.mxu0 %vm2705_vm3, %v2587_v12  ;;  %v236_v27 = vsub.f32 %v2745_v21, %v2752_v24  ;;  %v2145_v29 = vsel %vm2721_vm4, 1.0, %v2585_v1  ;;  %v2144_v31 = vsel %vm2733_vm5, 1.0, %v2585_v1  ;;  %p2505_p13 = pneg %p2504_p11  ;;  %p2511_p2 = por %p2510_p1, %p2509_p0 }
  0x34   : > { %v2738_v19 = vand.u32 4294901760, %v2719_v14  ;;  %v2741_v20 = vand.u32 4294901760, %v2725_v16  ;;  %2252 = vmatprep.subr.mxu0 %v2585_v1  ;;  %v2815_v30 = vsub.f32 %v2145_v29, %v2145_v29  ;;  %v2821_v34 = vsub.f32 %v2144_v31, %v2144_v31 }
  0x35   : > { %v2757_v28 = vand.u32 4294901760, %v236_v27  ;;  %p2512_p3 = pnand %p2511_p2, %p2505_p13 }
  0x36   : > { %v275_v22 = vsub.f32 %v2719_v14, %v2738_v19  ;;  %v282_v23 = vsub.f32 %v2725_v16, %v2741_v20  ;;  %v2826_v36 = vand.u32 4294901760, %v2815_v30  ;;  %v2838_v38 = vand.u32 4294901760, %v2821_v34 }
  0x37   : > { %2243 = vmatmul.mubr.f32.vlgmr.msra.gmra.mxu0 %v2757_v28 }
  0x38   : > { %v276_v25 = vand.u32 4294901760, %v275_v22  ;;  %v283_v26 = vand.u32 4294901760, %v282_v23  ;;  %2253 = vmatpush3.msra.mxu0 %v2719_v14  ;;  %2256 = vmatprep.mubr.msk.f32.mxu0 %vm2586_vm0, %v2585_v1  ;;  %v1208_v40 = vsub.f32 %v2815_v30, %v2826_v36  ;;  %v1215_v42 = vsub.f32 %v2821_v34, %v2838_v38 }
  0x39   : > { %2254 = vmatprep.subr.mxu0 %v2585_v1 }
  0x3a   : > { %2246 = vmatpush3.msra.mxu1 %v276_v25  ;;  %2255 = vmatpush3.msra.mxu0 %v2725_v16  ;;  %v1209_v44 = vand.u32 4294901760, %v1208_v40  ;;  %v1216_v45 = vand.u32 4294901760, %v1215_v42 }
  0x3b   : > { %2247 = vmatprep.subr.mxu1 %v2585_v1  ;;  %2257 = vmatmul.mubr.f32.vlgmr.msra.gmra.mxu0 %v2745_v21 }
  0x3c   : > { %2248 = vmatpush3.msra.mxu1 %v283_v26  ;;  %2266 = vmatprep.subr.mxu0 %v2585_v1 }
  0x3d   : > { %2250 = vmatmul.mubr.f32.vlgmr.msra.gmra.mxu1 %v2728_v17  ;;  %2259 = vmatprep.subr.mxu1 %v2585_v1 }
  0x3e   : > { %2260 = vmatpush3.msk.msra.mxu1 %vm2701_vm2, %v2587_v12  ;;  %2263 = vmatprep.mubr.msk.f32.mxu1 %vm2586_vm0, %v2585_v1 }
  0x3f   : > { %2261 = vmatprep.subr.mxu1 %v2585_v1  ;;  %2267 = vmatpush3.msra.mxu0 %v2738_v19 }
  0x40   : > { %2262 = vmatpush3.msk.msra.mxu1 %vm2705_vm3, %v2587_v12  ;;  %2268 = vmatprep.subr.mxu0 %v2585_v1 }
  0x41   : > { %2264 = vmatmul.mubr.f32.vlgmr.msra.gmra.mxu1 %v2752_v24  ;;  %2273 = vmatprep.subr.mxu1 %v2585_v1 }
  0x42   : > { %2274 = vmatpush3.msk.msra.mxu1 %vm2701_vm2, %v2587_v12  ;;  %2277 = vmatprep.mubr.msk.f32.mxu1 %vm2586_vm0, %v2585_v1 }
  0x43   : > { %2275 = vmatprep.subr.mxu1 %v2585_v1  ;;  %2269 = vmatpush3.msra.mxu0 %v2741_v20 }
  0x44   : > { %2276 = vmatpush3.msk.msra.mxu1 %vm2705_vm3, %v2587_v12  ;;  %2270 = vmatprep.mubr.msk.f32.mxu0 %vm2586_vm0, %v2585_v1 }
  0x45   : > { %2278 = vmatmul.mubr.f32.vlgmr.msra.gmra.mxu1 %v2728_v17  ;;  %2287 = vmatprep.subr.mxu1 %v2585_v1 }
  0x46   : > { %2288 = vmatpush3.msra.mxu1 %v276_v25  ;;  %2291 = vmatprep.mubr.msk.f32.mxu1 %vm2586_vm0, %v2585_v1 }
  0x47   : > { %2289 = vmatprep.subr.mxu1 %v2585_v1  ;;  %2271 = vmatmul.mubr.f32.vlgmr.msra.gmra.mxu0 %v2728_v17 }
  0x48   : > { %2290 = vmatpush3.msra.mxu1 %v283_v26  ;;  %2280 = vmatprep.subr.mxu0 %v2585_v1 }
  0x49   : > { %2301 = vmatprep.subr.mxu1 %v2585_v1  ;;  %2281 = vmatpush3.msk.msra.mxu0 %vm2701_vm2, %v2587_v12 }
  0x4a   : > { %2284 = vmatprep.mubr.msk.f32.mxu0 %vm2586_vm0, %v2585_v1  ;;  %2282 = vmatprep.subr.mxu0 %v2585_v1 }
  0x4b   : > { %2283 = vmatpush3.msk.msra.mxu0 %vm2705_vm3, %v2587_v12 }
  0x4c   : > { %2294 = vmatprep.subr.mxu0 %v2585_v1 }
  0x9f   : > { %v628_v32 = vpop.permute.xlu0 %627 }
  0xa0   : > { %v629_v33 = vsel %vm162_vm1, %v628_v32, 0 }
  0xa1   : > { %v2823_v35 = vand.u32 4294901760, %v629_v33 }
  0xa3   : > { %v2829_v37 = vsub.f32 %v629_v33, %v2823_v35  ;;  %2292 = vmatmul.mubr.f32.vlgmr.msra.gmra.mxu1 %v2823_v35 }
  0xa4   : > { %2302 = vmatpush3.msk.msra.mxu1 %vm2701_vm2, %v2587_v12  ;;  %2305 = vmatprep.mubr.msk.f32.mxu1 %vm2586_vm0, %v2585_v1 }
  0xa5   : > { %2303 = vmatprep.subr.mxu1 %v2585_v1  ;;  %v2842_v39 = vand.u32 4294901760, %v2829_v37 }
  0xa6   : > { %2304 = vmatpush3.msk.msra.mxu1 %vm2705_vm3, %v2587_v12 }
  0xa7   : > { %2306 = vmatmul.mubr.f32.vlgmr.msra.gmra.mxu1 %v2842_v39  ;;  %2315 = vmatprep.subr.mxu1 %v2585_v1  ;;  %v701_v41 = vsub.f32 %v2829_v37, %v2842_v39 }
  0xa8   : > { %2316 = vmatpush3.msk.msra.mxu1 %vm2701_vm2, %v2587_v12  ;;  %2319 = vmatprep.mubr.msk.f32.mxu1 %vm2586_vm0, %v2585_v1 }
  0xa9   : > { %2317 = vmatprep.subr.mxu1 %v2585_v1  ;;  %v2861_v43 = vand.u32 4294901760, %v701_v41 }
  0xaa   : > { %2318 = vmatpush3.msk.msra.mxu1 %vm2705_vm3, %v2587_v12 }
  0xab   : > { %2285 = vmatmul.mubr.f32.vlgmr.msra.gmra.mxu0 %v2861_v43  ;;  %2320 = vmatmul.mubr.f32.vlgmr.msra.gmra.mxu1 %v2823_v35 }
  0xac   : > { %2295 = vmatpush3.msra.mxu0 %v2719_v14  ;;  %2329 = vmatprep.subr.mxu1 %v2585_v1 }
  0xad   : > { %2296 = vmatprep.subr.mxu0 %v2585_v1  ;;  %2330 = vmatpush3.msra.mxu1 %v1209_v44 }
  0xae   : > { %2297 = vmatpush3.msra.mxu0 %v2725_v16  ;;  %2331 = vmatprep.subr.mxu1 %v2585_v1 }
  0xaf   : > { %2298 = vmatprep.mubr.msk.f32.mxu0 %vm2586_vm0, %v2585_v1  ;;  %2308 = vmatprep.subr.mxu0 %v2585_v1 }
  0xb0   : > { %2332 = vmatpush3.msra.mxu1 %v1216_v45  ;;  %2333 = vmatprep.mubr.msk.f32.mxu1 %vm2586_vm0, %v2585_v1 }
  0xb1   : > { %2299 = vmatmul.mubr.f32.vlgmr.msra.gmra.mxu0 %v2829_v37  ;;  %2334 = vmatmul.mubr.f32.vlgmr.msra.gmra.mxu1 %v2728_v17 }
  0xb2   : > { %2309 = vmatpush3.msra.mxu0 %v2738_v19  ;;  %2343 = vmatprep.subr.mxu1 %v2585_v1 }
  0xb3   : > { %2310 = vmatprep.subr.mxu0 %v2585_v1  ;;  %2344 = vmatpush3.msk.msra.mxu1 %vm2721_vm4, %v2587_v12 }
  0xb4   : > { %2311 = vmatpush3.msra.mxu0 %v2741_v20  ;;  %2345 = vmatprep.subr.mxu1 %v2585_v1 }
  0xb5   : > { %2312 = vmatprep.mubr.msk.f32.mxu0 %vm2586_vm0, %v2585_v1  ;;  %2322 = vmatprep.subr.mxu0 %v2585_v1 }
  0xb6   : > { %2346 = vmatpush3.msk.msra.mxu1 %vm2733_vm5, %v2587_v12  ;;  %2347 = vmatprep.mubr.msk.f32.mxu1 %vm2586_vm0, %v2585_v1 }
  0xb7   : > { %2313 = vmatmul.mubr.f32.vlgmr.msra.gmra.mxu0 %v2823_v35  ;;  %2348 = vmatmul.mubr.f32.vlgmr.msra.gmra.mxu1 %v2752_v24 }
  0xb8   : > { %2323 = vmatpush3.msk.msra.mxu0 %vm2721_vm4, %v2587_v12  ;;  %2357 = vmatprep.subr.mxu1 %v2585_v1 }
  0xb9   : > { %2324 = vmatprep.subr.mxu0 %v2585_v1  ;;  %2358 = vmatpush3.msk.msra.mxu1 %vm2721_vm4, %v2587_v12 }
  0xba   : > { %2325 = vmatpush3.msk.msra.mxu0 %vm2733_vm5, %v2587_v12  ;;  %2359 = vmatprep.subr.mxu1 %v2585_v1 }
  0xbb   : > { %2326 = vmatprep.mubr.msk.f32.mxu0 %vm2586_vm0, %v2585_v1  ;;  %2336 = vmatprep.subr.mxu0 %v2585_v1 }
  0xbc   : > { %2360 = vmatpush3.msk.msra.mxu1 %vm2733_vm5, %v2587_v12  ;;  %2361 = vmatprep.mubr.msk.f32.mxu1 %vm2586_vm0, %v2585_v1 }
  0xbd   : > { %2327 = vmatmul.mubr.f32.vlgmr.msra.gmra.mxu0 %v2757_v28  ;;  %2362 = vmatmul.mubr.f32.vlgmr.msra.gmra.mxu1 %v2728_v17 }
  0xbe   : > { %2337 = vmatpush3.msra.mxu0 %v2815_v30  ;;  %2371 = vmatprep.subr.mxu1 %v2585_v1 }
  0xbf   : > { %2338 = vmatprep.subr.mxu0 %v2585_v1  ;;  %2372 = vmatpush3.msra.mxu1 %v1209_v44 }
  0xc0   : > { %2339 = vmatpush3.msra.mxu0 %v2821_v34  ;;  %2373 = vmatprep.subr.mxu1 %v2585_v1 }
  0xc1   : > { %2340 = vmatprep.mubr.msk.f32.mxu0 %vm2586_vm0, %v2585_v1  ;;  %2350 = vmatprep.subr.mxu0 %v2585_v1 }
  0xc2   : > { %2374 = vmatpush3.msra.mxu1 %v1216_v45  ;;  %2375 = vmatprep.mubr.msk.f32.mxu1 %vm2586_vm0, %v2585_v1 }
  0xc3   : > { %2341 = vmatmul.mubr.f32.vlgmr.msra.gmra.mxu0 %v2745_v21  ;;  %2376 = vmatmul.mubr.f32.vlgmr.msra.gmra.mxu1 %v2823_v35 }
  0xc4   : > { %2351 = vmatpush3.msra.mxu0 %v2826_v36  ;;  %2385 = vmatprep.subr.mxu1 %v2585_v1 }
  0xc5   : > { %2352 = vmatprep.subr.mxu0 %v2585_v1  ;;  %2386 = vmatpush3.msk.msra.mxu1 %vm2721_vm4, %v2587_v12 }
  0xc6   : > { %2353 = vmatpush3.msra.mxu0 %v2838_v38  ;;  %2387 = vmatprep.subr.mxu1 %v2585_v1 }
  0xc7   : > { %2354 = vmatprep.mubr.msk.f32.mxu0 %vm2586_vm0, %v2585_v1  ;;  %2364 = vmatprep.subr.mxu0 %v2585_v1 }
  0xc8   : > { %2388 = vmatpush3.msk.msra.mxu1 %vm2733_vm5, %v2587_v12  ;;  %2389 = vmatprep.mubr.msk.f32.mxu1 %vm2586_vm0, %v2585_v1 }
  0xc9   : > { %2355 = vmatmul.mubr.f32.vlgmr.msra.gmra.mxu0 %v2728_v17  ;;  %2390 = vmatmul.mubr.f32.vlgmr.msra.gmra.mxu1 %v2842_v39 }
  0xca   : > { %2365 = vmatpush3.msk.msra.mxu0 %vm2721_vm4, %v2587_v12  ;;  %2399 = vmatprep.subr.mxu1 %v2585_v1 }
  0xcb   : > { %2366 = vmatprep.subr.mxu0 %v2585_v1  ;;  %2400 = vmatpush3.msk.msra.mxu1 %vm2721_vm4, %v2587_v12 }
  0xcc   : > { %2367 = vmatpush3.msk.msra.mxu0 %vm2733_vm5, %v2587_v12  ;;  %2401 = vmatprep.subr.mxu1 %v2585_v1 }
  0xcd   : > { %2368 = vmatprep.mubr.msk.f32.mxu0 %vm2586_vm0, %v2585_v1  ;;  %2378 = vmatprep.subr.mxu0 %v2585_v1 }
  0xce   : > { %2402 = vmatpush3.msk.msra.mxu1 %vm2733_vm5, %v2587_v12  ;;  %2403 = vmatprep.mubr.msk.f32.mxu1 %vm2586_vm0, %v2585_v1 }
  0xcf   : > { %2369 = vmatmul.mubr.f32.vlgmr.msra.gmra.mxu0 %v2861_v43  ;;  %2404 = vmatmul.mubr.f32.vlgmr.msra.gmra.mxu1 %v2823_v35 }
  0xd0   : > { %2379 = vmatpush3.msra.mxu0 %v2815_v30  ;;  %2382 = vmatprep.mubr.msk.f32.mxu0 %vm2586_vm0, %v2585_v1 }
  0xd1   : > { %2380 = vmatprep.subr.mxu0 %v2585_v1 }
  0xd2   : > { %2381 = vmatpush3.msra.mxu0 %v2821_v34 }
  0xd3   : > { %2392 = vmatprep.subr.mxu0 %v2585_v1  ;;  %2383 = vmatmul.mubr.f32.vlgmr.msra.gmra.mxu0 %v2829_v37 }
  0xd4   : > { %2393 = vmatpush3.msra.mxu0 %v2826_v36  ;;  %2396 = vmatprep.mubr.msk.f32.mxu0 %vm2586_vm0, %v2585_v1 }
  0xd5   : > { %2394 = vmatprep.subr.mxu0 %v2585_v1 }
  0xd6   : > { %2395 = vmatpush3.msra.mxu0 %v2838_v38 }
  0xd7   : > { %2397 = vmatmul.mubr.f32.vlgmr.msra.gmra.mxu0 %v2823_v35 }
  0xf7   : > { %v239_v48 = vpop.f32.mrf.mxu0 }
  0xf9   : > { %v2244_v50 = vpop.f32.mrf.mxu0 }
  0xfb   : > { %v396_v54 = vpop.f32.mrf.mxu0 }
  0xfd   : > { %v320_v46 = vpop.f32.mrf.mxu1  ;;  %v2258_v57 = vpop.f32.mrf.mxu0 }
  0xfe   : > { %v321_v52 = vadd.f32 %v320_v46, %v239_v48 }
  0xff   : > { %v2251_v47 = vpop.f32.mrf.mxu1 }
 0x100   : > { %v397_v56 = vadd.f32 %v396_v54, %v321_v52 }
 0x101   : > { %v471_v49 = vpop.f32.mrf.mxu1 }
 0x102   : > { %v472_v58 = vadd.f32 %v471_v49, %v397_v56 }
 0x103   : > { %v2265_v51 = vpop.f32.mrf.mxu1 }
 0x105   : > { %v621_v53 = vpop.f32.mrf.mxu1 }
 0x107   : > { %v2279_v55 = vpop.f32.mrf.mxu1  ;;  %v548_v59 = vpop.f32.mrf.mxu0 }
 0x108   : > { %v549_v60 = vadd.f32 %v548_v59, %v472_v58 }
 0x109   : > { %v2272_v61 = vpop.f32.mrf.mxu0 }
 0x10a   : > { %v622_v62 = vadd.f32 %v621_v53, %v549_v60 }
 0x10c   : > { %626 = vst.msk [vmem:[%s2986_s23] sm:$0xff] %vm625_vm6, %v622_v62 }
 0x163   : > { %v785_v63 = vpop.f32.mrf.mxu1 }
 0x165   : > { %v2293_v0 = vpop.f32.mrf.mxu1 }
 0x167   : > { %v936_v1 = vpop.f32.mrf.mxu1 }
 0x169   : > { %v2307_v2 = vpop.f32.mrf.mxu1 }
 0x16b   : > { %v704_v3 = vpop.f32.mrf.mxu0  ;;  %v1086_v4 = vpop.f32.mrf.mxu1 }
 0x16c   : > { %v786_v7 = vadd.f32 %v785_v63, %v704_v3 }
 0x16d   : > { %v2286_v5 = vpop.f32.mrf.mxu0  ;;  %v2321_v6 = vpop.f32.mrf.mxu1 }
 0x171   : > { %v861_v8 = vpop.f32.mrf.mxu0  ;;  %v1253_v9 = vpop.f32.mrf.mxu1 }
 0x172   : > { %v862_v10 = vadd.f32 %v861_v8, %v786_v7 }
 0x173   : > { %v2300_v11 = vpop.f32.mrf.mxu0  ;;  %v2335_v12 = vpop.f32.mrf.mxu1 }
 0x174   : > { %v937_v13 = vadd.f32 %v936_v1, %v862_v10 }
 0x177   : > { %v1013_v14 = vpop.f32.mrf.mxu0  ;;  %v1404_v15 = vpop.f32.mrf.mxu1 }
 0x178   : > { %v1014_v16 = vadd.f32 %v1013_v14, %v937_v13 }
 0x179   : > { %v2314_v17 = vpop.f32.mrf.mxu0  ;;  %v2349_v18 = vpop.f32.mrf.mxu1 }
 0x17a   : > { %v1087_v19 = vadd.f32 %v1086_v4, %v1014_v16 }
 0x17c   : > { %2143 = vst.msk [vmem:[%s2986_s23 + $0x10] sm:$0xff] %vm625_vm6, %v1087_v19 }
 0x17d   : > { %v1172_v20 = vpop.f32.mrf.mxu0  ;;  %v1554_v21 = vpop.f32.mrf.mxu1 }
 0x17e   : > { %v1254_v24 = vadd.f32 %v1253_v9, %v1172_v20 }
 0x17f   : > { %v2328_v22 = vpop.f32.mrf.mxu0  ;;  %v2363_v23 = vpop.f32.mrf.mxu1 }
 0x183   : > { %v1329_v25 = vpop.f32.mrf.mxu0  ;;  %v1714_v26 = vpop.f32.mrf.mxu1 }
 0x184   : > { %v1330_v27 = vadd.f32 %v1329_v25, %v1254_v24 }
 0x185   : > { %v2342_v28 = vpop.f32.mrf.mxu0  ;;  %v2377_v29 = vpop.f32.mrf.mxu1 }
 0x186   : > { %v1405_v30 = vadd.f32 %v1404_v15, %v1330_v27 }
 0x189   : > { %v1481_v31 = vpop.f32.mrf.mxu0  ;;  %v1865_v32 = vpop.f32.mrf.mxu1 }
 0x18a   : > { %v1482_v33 = vadd.f32 %v1481_v31, %v1405_v30 }
 0x18b   : > { %v2356_v34 = vpop.f32.mrf.mxu0  ;;  %v2391_v35 = vpop.f32.mrf.mxu1 }
 0x18c   : > { %v1555_v36 = vadd.f32 %v1554_v21, %v1482_v33 }
 0x18e   : > { %2152 = vst.msk [vmem:[%s2986_s23 + $0x8] sm:$0xff] %vm625_vm6, %v1555_v36 }
 0x18f   : > { %v1633_v37 = vpop.f32.mrf.mxu0  ;;  %v2015_v38 = vpop.f32.mrf.mxu1 }
 0x190   : > { %v1715_v41 = vadd.f32 %v1714_v26, %v1633_v37 }
 0x191   : > { %v2370_v39 = vpop.f32.mrf.mxu0  ;;  %v2405_v40 = vpop.f32.mrf.mxu1 }
 0x193   : > { %v1790_v42 = vpop.f32.mrf.mxu0 }
 0x194   : > { %v1791_v43 = vadd.f32 %v1790_v42, %v1715_v41 }
 0x195   : > { %v2384_v44 = vpop.f32.mrf.mxu0 }
 0x196   : > { %v1866_v45 = vadd.f32 %v1865_v32, %v1791_v43 }
 0x197   : > { %v1942_v46 = vpop.f32.mrf.mxu0 }
 0x198   : > { %v1943_v47 = vadd.f32 %v1942_v46, %v1866_v45 }
 0x199   : > { %v2398_v48 = vpop.f32.mrf.mxu0 }
 0x19a   : > { %v2016_v49 = vadd.f32 %v2015_v38, %v1943_v47 }
 0x19c   : > { %2159 = vst.msk [vmem:[%s2986_s23 + $0x18] sm:$0xff] %vm625_vm6, %v2016_v49 }
 0x19d   : > { %2515 = shalt.err (!%p2512_p3)
}
 0x19e   : > { %s2516_s4 = scalar_lea.hbm %s3001_s28, 512  ;;  %s2520_s15 = scalar_lea.hbm %s3051_s1, 4096 }
 0x19f   : > { %p2517_p5 = scmp.ne.s32.totalorder %s3001_s28, %s2516_s4  ;;  %p2521_p10 = scmp.lt.s32.totalorder %s3001_s28, %s3051_s1 }
 0x1a0   : > { %p2522_p4 = scmp.lt.s32.totalorder %s2520_s15, %s2516_s4 }
 0x1a1   : > { %p2518_p6 = pnand %p2517_p5, %p2653_p9 }
 0x1a2   : > { %p2523_p12 = por %p2522_p4, %p2521_p10 }
 0x1a3   : > { %p2519_p7 = pneg %p2518_p6 }
 0x1a5   : > { %p2524_p8 = pnand %p2523_p12, %p2519_p7 }
 0x1a7   : > { %2527 = shalt.err (!%p2524_p8)
}
 0x1a8   : > { %s2590_s18 = smov 128   ;;  %s2591_s22 = smov 8  }
 0x1a9   : > { %2408 = dma.vmem_to_hbm [thread:$0]  (%p2653_p9), %s2996_s24, 512, %s3001_s28, %s2022_s29, %s2590_s18, %s2590_s18, %s2591_s22  }
 0x1aa PF: > { %p2419_p11 = scmp.ge.s32.totalorder %s2582_s11, 2  ;;  %s2051_s23 = sand.u32 1, %s2562_s6  }
 0x1ab   : > { %p3065_p13 = scmp.ne.s32.totalorder %s3055_s21, 0  ;;  %s2052_s25 = scalar_lea.sflag [#allocation4], %s2051_s23 }
 0x1ad   : > { %p2415_p0 = pnand %p2419_p11, %p3065_p13 }
 0x1af   : > { %p2416_p1 = pneg %p2415_p0 }
 0x1b1   : > { %2557 = dma.done.wait (%p2416_p1), %s2052_s25, 512  }
 0x1b2   : > { %2559 = vsyncadd (%p2416_p1), %s2052_s25, 4294966784  ;;  %s17_s11 = sadd.s32 1, %s2582_s11   ;;  %s3066_s6 = smov %s2566_s7 }
 0x1b3   : > { %p14_p2 = scmp.ge.s32.totalorder %s17_s11, 10   ;;  %s3067_s7 = smov %s2570_s8 }
 0x1b4   : > { %s3068_s8 = smov %s2658_s20  ;;  %s3069_s9 = smov %s2578_s10 }
 0x1b5   : > { %s3070_s10 = smov %s3072_s14  ;;  %16 = sbr.rel (!%p14_p2) target bundleno = 6 (0x6), region = 72 }
 0x1ba   :  { %2057 = vsyncpa [#allocation3], 1 }
 0x1bb   :  { %2059 = vsyncpa [#allocation3 + $0x1], 1 }
 0x1bc   :  { %2060 = vsyncpa [#allocation4], 1 }
 0x1bd   :  { %2062 = vsyncpa [#allocation4 + $0x1], 1 }

</bundles_post_ra>
